<compile_context>
chip_gen: v5e
topology: v5e:2x2
jax: 0.10.0
libtpu: 0.0.40
codegen_flags: <defaults>
</compile_context>

<pallas_src>
import functools

import jax
import jax.numpy as jnp
from jax.experimental import pallas as pl
from jax.experimental.pallas import tpu as pltpu


def _pick_tile(n, candidates=(512, 256, 128)):
    for t in candidates:
        if n % t == 0:
            return t
    # TODO(synk): N that is neither 128-aligned nor small enough for a single
    # tile would need masked partial tiles; fall back to one full-size tile.
    return n


def _min_prod_kernel(q_ref, g_ref, out_ref):
    """Column-wise min of qn @ gn^T, accumulated over row tiles."""
    i = pl.program_id(1)  # row tile (reduction axis, innermost)

    @pl.when(i == 0)
    def _():
        out_ref[...] = jnp.full(out_ref.shape, jnp.inf, dtype=out_ref.dtype)

    prod = jax.lax.dot_general(                      # (TM, TN) on MXU
        q_ref[...], g_ref[...], (((1,), (1,)), ((), ())),
        preferred_element_type=jnp.float32)
    out_ref[...] = jnp.minimum(out_ref[...],
                               jnp.min(prod, axis=0, keepdims=True))


def _ap_hist_kernel(inv_bl_ref, q_ref, g_ref, pid_row_ref, pid_col_ref,
                    out_ref, st_ref, sa_ref, cnt_ref, *, bin_num):
    """Histogram / AP accumulation for one column tile, over all row tiles."""
    i = pl.program_id(1)          # row tile (reduction axis, innermost)
    n_rows = pl.num_programs(1)

    @pl.when(i == 0)
    def _():
        st_ref[...] = jnp.zeros_like(st_ref)
        sa_ref[...] = jnp.zeros_like(sa_ref)
        cnt_ref[...] = jnp.zeros_like(cnt_ref)

    prod = jax.lax.dot_general(                      # (TM, TN) on MXU
        q_ref[...], g_ref[...], (((1,), (1,)), ((), ())),
        preferred_element_type=jnp.float32)
    # Inputs are L2-normalized, so ||q||^2 = ||g||^2 = 1.
    dist = jnp.sqrt(jnp.maximum(2.0 - 2.0 * prod, 1e-12))
    dist_s = dist * inv_bl_ref[0, 0]                 # bin centers become 0..B-1

    # Boolean same-identity mask. count is accumulated over rows; the mask is
    # symmetric (both pid operands come from the same vector), so this equals
    # the reference's is_pos.sum(dim=-1).
    is_pos = pid_row_ref[...] == pid_col_ref[...]    # (TM, TN) bool
    cnt_ref[...] += jnp.sum(is_pos.astype(jnp.float32), axis=0, keepdims=True)

    for b in range(bin_num):                         # static unroll, small
        ind = jnp.maximum(1.0 - jnp.abs(dist_s - float(b)), 0.0)
        st_ref[pl.ds(b, 1), :] += jnp.sum(jnp.where(is_pos, ind, 0.0),
                                          axis=0, keepdims=True)
        sa_ref[pl.ds(b, 1), :] += jnp.sum(ind, axis=0, keepdims=True)

    @pl.when(i == n_rows - 1)
    def _():
        st = st_ref[...]                             # (bin_num, TN)
        pm = st / jnp.maximum(sa_ref[...], 1e-12)
        rm = st / cnt_ref[...]                       # count >= 1 (diagonal)
        out_ref[...] = jnp.sum(pm * rm, axis=0, keepdims=True)   # (1, TN)


@functools.partial(jax.jit, static_argnames=("bin_num",))
def ap_loss(atta_q_feat, g_feat, pids, bin_num=10):
    assert atta_q_feat.shape == g_feat.shape
    assert atta_q_feat.shape[0] == pids.shape[0]
    n, d = atta_q_feat.shape

    # F.normalize(x, dim=1, p=2): x / max(||x||, 1e-12); keep all math in f32.
    q = atta_q_feat.astype(jnp.float32)
    g = g_feat.astype(jnp.float32)
    qn = q / jnp.maximum(jnp.sqrt(jnp.sum(q * q, axis=1, keepdims=True)), 1e-12)
    gn = g / jnp.maximum(jnp.sqrt(jnp.sum(g * g, axis=1, keepdims=True)), 1e-12)

    # Pad feature dim to a multiple of 128 (zero padding is exact for dots).
    d_pad = ((d + 127) // 128) * 128
    if d_pad != d:
        qn = jnp.pad(qn, ((0, 0), (0, d_pad - d)))
        gn = jnp.pad(gn, ((0, 0), (0, d_pad - d)))

    tile_m = _pick_tile(n)
    tile_n = _pick_tile(n)
    n_row = n // tile_m
    n_col = n // tile_n

    feat_row_spec = pl.BlockSpec((tile_m, d_pad), lambda j, i: (i, 0))
    feat_col_spec = pl.BlockSpec((tile_n, d_pad), lambda j, i: (j, 0))
    col_vec_spec = pl.BlockSpec((1, tile_n), lambda j, i: (0, j))
    parallel_cols = pltpu.CompilerParams(
        dimension_semantics=("parallel", "arbitrary"))

    # ---- pass 1: global max distance (via min of the similarity matrix) ----
    min_cols = pl.pallas_call(
        _min_prod_kernel,
        out_shape=jax.ShapeDtypeStruct((1, n), jnp.float32),
        grid=(n_col, n_row),
        in_specs=[feat_row_spec, feat_col_spec],
        out_specs=col_vec_spec,
        compiler_params=parallel_cols,
    )(qn, gn)

    dmax = jnp.sqrt(jnp.maximum(2.0 - 2.0 * jnp.min(min_cols), 1e-12))
    bin_len = jnp.ceil(dmax) / jnp.float32(bin_num - 1)      # f32, matches ref
    inv_bin_len = (1.0 / bin_len).reshape(1, 1).astype(jnp.float32)

    pids_row = pids.astype(jnp.int32).reshape(n, 1)
    pids_col = pids.astype(jnp.int32).reshape(1, n)

    # ---- pass 2: histogram / AP accumulation -------------------------------
    kernel = functools.partial(_ap_hist_kernel, bin_num=bin_num)
    ap_cols = pl.pallas_call(
        kernel,
        out_shape=jax.ShapeDtypeStruct((1, n), jnp.float32),
        grid=(n_col, n_row),
        in_specs=[
            pl.BlockSpec(memory_space=pltpu.MemorySpace.SMEM),   # 1/bin_len
            feat_row_spec,                                       # qn (rows)
            feat_col_spec,                                       # gn (cols)
            pl.BlockSpec((tile_m, 1), lambda j, i: (i, 0)),      # pids (rows)
            col_vec_spec,                                        # pids (cols)
        ],
        out_specs=col_vec_spec,
        scratch_shapes=[
            pltpu.VMEM((bin_num, tile_n), jnp.float32),  # sum true indicator
            pltpu.VMEM((bin_num, tile_n), jnp.float32),  # sum all indicator
            pltpu.VMEM((1, tile_n), jnp.float32),        # same-identity count
        ],
        compiler_params=parallel_cols,
    )(inv_bin_len, qn, gn, pids_row, pids_col)

    return jnp.sum(ap_cols) / jnp.float32(n)


def _ap_loss_ref(q, g, pids, bin_num=10):
    # Pure-JAX mirror of the PyTorch map_loss (validation only).
    n = q.shape[0]
    qn = q / jnp.maximum(jnp.linalg.norm(q, axis=1, keepdims=True), 1e-12)
    gn = g / jnp.maximum(jnp.linalg.norm(g, axis=1, keepdims=True), 1e-12)
    xx = jnp.sum(qn * qn, axis=1, keepdims=True)
    yy = jnp.sum(gn * gn, axis=1, keepdims=True)
    dist = xx + yy.T - 2.0 * (qn @ gn.T)
    dist = jnp.sqrt(jnp.maximum(dist, 1e-12))
    bin_len = jnp.ceil(jnp.max(dist)) / (bin_num - 1)
    is_pos = (pids[:, None] == pids[None, :]).astype(jnp.float32)
    bm = jnp.arange(bin_num, dtype=jnp.float32) * bin_len
    ind = jnp.maximum(1.0 - jnp.abs(dist[None] - bm[:, None, None]) / bin_len, 0.0)
    st = jnp.sum(is_pos[None] * ind, axis=1)
    sa = jnp.sum(ind, axis=1)
    pm = st / jnp.maximum(sa, 1e-12)
    rm = st / jnp.sum(is_pos, axis=-1)
    return jnp.sum(pm * rm) / n


if __name__ == "__main__":
    key = jax.random.PRNGKey(0)
    kq, kg = jax.random.split(key)
    N, D = 8, 32
    atta_q_feat = jax.random.normal(kq, (N, D), dtype=jnp.float32)
    g_feat = jax.random.normal(kg, (N, D), dtype=jnp.float32)
    pids = jnp.array([0, 0, 1, 1, 2, 2, 3, 3], dtype=jnp.int32)

    loss = ap_loss(atta_q_feat, g_feat, pids, bin_num=10)
    loss = jax.block_until_ready(loss)

    ref = _ap_loss_ref(atta_q_feat, g_feat, pids, bin_num=10)
    assert jnp.isfinite(loss), "non-finite loss"
    assert jnp.allclose(loss, ref, rtol=1e-3, atol=1e-3), (loss, ref)
    print("KERNEL_OK")
</pallas_src>

<mosaic_0001>
module attributes {stable_mosaic.version = 11 : i64} {
  func.func @_ap_hist_kernel(%arg0: i32, %arg1: i32, %arg2: memref<1x1xf32, #tpu.memory_space<smem>>, %arg3: memref<8x128xf32, #tpu.memory_space<vmem>>, %arg4: memref<8x128xf32, #tpu.memory_space<vmem>>, %arg5: memref<8x1xi32, #tpu.memory_space<vmem>>, %arg6: memref<1x8xi32, #tpu.memory_space<vmem>>, %arg7: memref<1x8xf32, #tpu.memory_space<vmem>>, %arg8: memref<10x8xf32, #tpu.memory_space<vmem>>, %arg9: memref<10x8xf32, #tpu.memory_space<vmem>>, %arg10: memref<1x8xf32, #tpu.memory_space<vmem>>) attributes {dimension_semantics = [#tpu.dimension_semantics<parallel>, #tpu.dimension_semantics<arbitrary>], iteration_bounds = array<i64: 1, 1>, scalar_prefetch = 0 : i64, scratch_operands = 3 : i64, tpu.core_type = #tpu.core_type<tc>, window_params = [{transform_indices = @transform_0, window_bounds = array<i64: 1, 1>}, {transform_indices = @transform_1, window_bounds = array<i64: 8, 128>}, {transform_indices = @transform_2, window_bounds = array<i64: 8, 128>}, {transform_indices = @transform_3, window_bounds = array<i64: 8, 1>}, {transform_indices = @transform_4, window_bounds = array<i64: 1, 8>}, {transform_indices = @transform_5, window_bounds = array<i64: 1, 8>}]} {
    %c0_i32 = arith.constant 0 : i32
    %0 = arith.cmpi eq, %arg1, %c0_i32 : i32
    %1 = arith.extui %0 : i1 to i32
    %c0_i32_0 = arith.constant 0 : i32
    %2 = arith.cmpi ne, %1, %c0_i32_0 : i32
    scf.if %2 {
      %cst_151 = arith.constant 0.000000e+00 : f32
      %221 = vector.broadcast %cst_151 : f32 to vector<10x8xf32>
      %c0_152 = arith.constant 0 : index
      %c0_153 = arith.constant 0 : index
      %222 = vector.load %arg8[%c0_152, %c0_153] : memref<10x8xf32, #tpu.memory_space<vmem>>, vector<10x8xf32>
      tpu.vector_store %arg8[%c0_152, %c0_153], %221 {strides = array<i32>} : memref<10x8xf32, #tpu.memory_space<vmem>>, vector<10x8xf32>,
      %cst_154 = arith.constant 0.000000e+00 : f32
      %223 = vector.broadcast %cst_154 : f32 to vector<10x8xf32>
      %c0_155 = arith.constant 0 : index
      %c0_156 = arith.constant 0 : index
      %224 = vector.load %arg9[%c0_155, %c0_156] : memref<10x8xf32, #tpu.memory_space<vmem>>, vector<10x8xf32>
      tpu.vector_store %arg9[%c0_155, %c0_156], %223 {strides = array<i32>} : memref<10x8xf32, #tpu.memory_space<vmem>>, vector<10x8xf32>,
      %cst_157 = arith.constant 0.000000e+00 : f32
      %225 = vector.broadcast %cst_157 : f32 to vector<1x8xf32>
      %c0_158 = arith.constant 0 : index
      %c0_159 = arith.constant 0 : index
      %226 = vector.load %arg10[%c0_158, %c0_159] : memref<1x8xf32, #tpu.memory_space<vmem>>, vector<1x8xf32>
      tpu.vector_store %arg10[%c0_158, %c0_159], %225 {strides = array<i32>} : memref<1x8xf32, #tpu.memory_space<vmem>>, vector<1x8xf32>,
    } else {
    }
    %c0 = arith.constant 0 : index
    %c0_1 = arith.constant 0 : index
    %3 = vector.load %arg3[%c0, %c0_1] : memref<8x128xf32, #tpu.memory_space<vmem>>, vector<8x128xf32>
    %c0_2 = arith.constant 0 : index
    %c0_3 = arith.constant 0 : index
    %4 = vector.load %arg4[%c0_2, %c0_3] : memref<8x128xf32, #tpu.memory_space<vmem>>, vector<8x128xf32>
    %cst = arith.constant dense<0.000000e+00> : vector<8x8xf32>
    %5 = tpu.matmul %3, %4, %cst {dimension_numbers = #tpu.dot_dimension_numbers<[1], [1], [0], [0], [0, 0, 1, 0], [], []>} : vector<8x128xf32>, vector<8x128xf32>, vector<8x8xf32> -> vector<8x8xf32>
    %cst_4 = arith.constant 2.000000e+00 : f32
    %6 = vector.broadcast %cst_4 : f32 to vector<8x8xf32>
    %7 = arith.mulf %6, %5 : vector<8x8xf32>
    %cst_5 = arith.constant 2.000000e+00 : f32
    %8 = vector.broadcast %cst_5 : f32 to vector<8x8xf32>
    %9 = arith.subf %8, %7 : vector<8x8xf32>
    %cst_6 = arith.constant 9.99999996E-13 : f32
    %10 = vector.broadcast %cst_6 : f32 to vector<8x8xf32>
    %11 = arith.maximumf %9, %10 : vector<8x8xf32>
    %12 = math.sqrt %11 : vector<8x8xf32>
    %c0_7 = arith.constant 0 : index
    %c0_8 = arith.constant 0 : index
    %13 = memref.load %arg2[%c0_7, %c0_8] : memref<1x1xf32, #tpu.memory_space<smem>>
    %14 = vector.broadcast %13 : f32 to vector<8x8xf32>
    %15 = arith.mulf %12, %14 : vector<8x8xf32>
    %c0_9 = arith.constant 0 : index
    %c0_10 = arith.constant 0 : index
    %16 = vector.load %arg5[%c0_9, %c0_10] : memref<8x1xi32, #tpu.memory_space<vmem>>, vector<8x1xi32>
    %c0_11 = arith.constant 0 : index
    %c0_12 = arith.constant 0 : index
    %17 = vector.load %arg6[%c0_11, %c0_12] : memref<1x8xi32, #tpu.memory_space<vmem>>, vector<1x8xi32>
    %18 = vector.broadcast %16 : vector<8x1xi32> to vector<8x8xi32>
    %19 = vector.broadcast %17 : vector<1x8xi32> to vector<8x8xi32>
    %20 = arith.cmpi eq, %18, %19 : vector<8x8xi32>
    %c0_13 = arith.constant 0 : index
    %c0_14 = arith.constant 0 : index
    %21 = vector.load %arg10[%c0_13, %c0_14] : memref<1x8xf32, #tpu.memory_space<vmem>>, vector<1x8xf32>
    %22 = arith.extui %20 : vector<8x8xi1> to vector<8x8xi32>
    %23 = arith.sitofp %22 : vector<8x8xi32> to vector<8x8xf32>
    %cst_15 = arith.constant dense<0.000000e+00> : vector<8xf32>
    %24 = vector.multi_reduction <add>, %23, %cst_15 [0] : vector<8x8xf32> to vector<8xf32>
    %25 = vector.shape_cast %24 : vector<8xf32> to vector<1x8xf32>
    %26 = arith.addf %21, %25 : vector<1x8xf32>
    %c0_16 = arith.constant 0 : index
    %c0_17 = arith.constant 0 : index
    %27 = vector.load %arg10[%c0_16, %c0_17] : memref<1x8xf32, #tpu.memory_space<vmem>>, vector<1x8xf32>
    tpu.vector_store %arg10[%c0_16, %c0_17], %26 {strides = array<i32>} : memref<1x8xf32, #tpu.memory_space<vmem>>, vector<1x8xf32>,
    %cst_18 = arith.constant 0.000000e+00 : f32
    %28 = vector.broadcast %cst_18 : f32 to vector<8x8xf32>
    %29 = arith.subf %15, %28 : vector<8x8xf32>
    %30 = math.absf %29 : vector<8x8xf32>
    %cst_19 = arith.constant 1.000000e+00 : f32
    %31 = vector.broadcast %cst_19 : f32 to vector<8x8xf32>
    %32 = arith.subf %31, %30 : vector<8x8xf32>
    %cst_20 = arith.constant 0.000000e+00 : f32
    %33 = vector.broadcast %cst_20 : f32 to vector<8x8xf32>
    %34 = arith.maximumf %32, %33 : vector<8x8xf32>
    %c0_21 = arith.constant 0 : index
    %c0_22 = arith.constant 0 : index
    %35 = vector.load %arg8[%c0_21, %c0_22] : memref<10x8xf32, #tpu.memory_space<vmem>>, vector<1x8xf32>
    %cst_23 = arith.constant 0.000000e+00 : f32
    %36 = vector.broadcast %cst_23 : f32 to vector<8x8xf32>
    %37 = arith.select %20, %34, %36 : vector<8x8xi1>, vector<8x8xf32>
    %cst_24 = arith.constant dense<0.000000e+00> : vector<8xf32>
    %38 = vector.multi_reduction <add>, %37, %cst_24 [0] : vector<8x8xf32> to vector<8xf32>
    %39 = vector.shape_cast %38 : vector<8xf32> to vector<1x8xf32>
    %40 = arith.addf %35, %39 : vector<1x8xf32>
    %c0_25 = arith.constant 0 : index
    %c0_26 = arith.constant 0 : index
    %41 = vector.load %arg8[%c0_25, %c0_26] : memref<10x8xf32, #tpu.memory_space<vmem>>, vector<1x8xf32>
    tpu.vector_store %arg8[%c0_25, %c0_26], %40 {strides = array<i32>} : memref<10x8xf32, #tpu.memory_space<vmem>>, vector<1x8xf32>,
    %c0_27 = arith.constant 0 : index
    %c0_28 = arith.constant 0 : index
    %42 = vector.load %arg9[%c0_27, %c0_28] : memref<10x8xf32, #tpu.memory_space<vmem>>, vector<1x8xf32>
    %cst_29 = arith.constant dense<0.000000e+00> : vector<8xf32>
    %43 = vector.multi_reduction <add>, %34, %cst_29 [0] : vector<8x8xf32> to vector<8xf32>
    %44 = vector.shape_cast %43 : vector<8xf32> to vector<1x8xf32>
    %45 = arith.addf %42, %44 : vector<1x8xf32>
    %c0_30 = arith.constant 0 : index
    %c0_31 = arith.constant 0 : index
    %46 = vector.load %arg9[%c0_30, %c0_31] : memref<10x8xf32, #tpu.memory_space<vmem>>, vector<1x8xf32>
    tpu.vector_store %arg9[%c0_30, %c0_31], %45 {strides = array<i32>} : memref<10x8xf32, #tpu.memory_space<vmem>>, vector<1x8xf32>,
    %cst_32 = arith.constant 1.000000e+00 : f32
    %47 = vector.broadcast %cst_32 : f32 to vector<8x8xf32>
    %48 = arith.subf %15, %47 : vector<8x8xf32>
    %49 = math.absf %48 : vector<8x8xf32>
    %cst_33 = arith.constant 1.000000e+00 : f32
    %50 = vector.broadcast %cst_33 : f32 to vector<8x8xf32>
    %51 = arith.subf %50, %49 : vector<8x8xf32>
    %cst_34 = arith.constant 0.000000e+00 : f32
    %52 = vector.broadcast %cst_34 : f32 to vector<8x8xf32>
    %53 = arith.maximumf %51, %52 : vector<8x8xf32>
    %c1 = arith.constant 1 : index
    %c0_35 = arith.constant 0 : index
    %54 = vector.load %arg8[%c1, %c0_35] : memref<10x8xf32, #tpu.memory_space<vmem>>, vector<1x8xf32>
    %cst_36 = arith.constant 0.000000e+00 : f32
    %55 = vector.broadcast %cst_36 : f32 to vector<8x8xf32>
    %56 = arith.select %20, %53, %55 : vector<8x8xi1>, vector<8x8xf32>
    %cst_37 = arith.constant dense<0.000000e+00> : vector<8xf32>
    %57 = vector.multi_reduction <add>, %56, %cst_37 [0] : vector<8x8xf32> to vector<8xf32>
    %58 = vector.shape_cast %57 : vector<8xf32> to vector<1x8xf32>
    %59 = arith.addf %54, %58 : vector<1x8xf32>
    %c1_38 = arith.constant 1 : index
    %c0_39 = arith.constant 0 : index
    %60 = vector.load %arg8[%c1_38, %c0_39] : memref<10x8xf32, #tpu.memory_space<vmem>>, vector<1x8xf32>
    tpu.vector_store %arg8[%c1_38, %c0_39], %59 {strides = array<i32>} : memref<10x8xf32, #tpu.memory_space<vmem>>, vector<1x8xf32>,
    %c1_40 = arith.constant 1 : index
    %c0_41 = arith.constant 0 : index
    %61 = vector.load %arg9[%c1_40, %c0_41] : memref<10x8xf32, #tpu.memory_space<vmem>>, vector<1x8xf32>
    %cst_42 = arith.constant dense<0.000000e+00> : vector<8xf32>
    %62 = vector.multi_reduction <add>, %53, %cst_42 [0] : vector<8x8xf32> to vector<8xf32>
    %63 = vector.shape_cast %62 : vector<8xf32> to vector<1x8xf32>
    %64 = arith.addf %61, %63 : vector<1x8xf32>
    %c1_43 = arith.constant 1 : index
    %c0_44 = arith.constant 0 : index
    %65 = vector.load %arg9[%c1_43, %c0_44] : memref<10x8xf32, #tpu.memory_space<vmem>>, vector<1x8xf32>
    tpu.vector_store %arg9[%c1_43, %c0_44], %64 {strides = array<i32>} : memref<10x8xf32, #tpu.memory_space<vmem>>, vector<1x8xf32>,
    %cst_45 = arith.constant 2.000000e+00 : f32
    %66 = vector.broadcast %cst_45 : f32 to vector<8x8xf32>
    %67 = arith.subf %15, %66 : vector<8x8xf32>
    %68 = math.absf %67 : vector<8x8xf32>
    %cst_46 = arith.constant 1.000000e+00 : f32
    %69 = vector.broadcast %cst_46 : f32 to vector<8x8xf32>
    %70 = arith.subf %69, %68 : vector<8x8xf32>
    %cst_47 = arith.constant 0.000000e+00 : f32
    %71 = vector.broadcast %cst_47 : f32 to vector<8x8xf32>
    %72 = arith.maximumf %70, %71 : vector<8x8xf32>
    %c2 = arith.constant 2 : index
    %c0_48 = arith.constant 0 : index
    %73 = vector.load %arg8[%c2, %c0_48] : memref<10x8xf32, #tpu.memory_space<vmem>>, vector<1x8xf32>
    %cst_49 = arith.constant 0.000000e+00 : f32
    %74 = vector.broadcast %cst_49 : f32 to vector<8x8xf32>
    %75 = arith.select %20, %72, %74 : vector<8x8xi1>, vector<8x8xf32>
    %cst_50 = arith.constant dense<0.000000e+00> : vector<8xf32>
    %76 = vector.multi_reduction <add>, %75, %cst_50 [0] : vector<8x8xf32> to vector<8xf32>
    %77 = vector.shape_cast %76 : vector<8xf32> to vector<1x8xf32>
    %78 = arith.addf %73, %77 : vector<1x8xf32>
    %c2_51 = arith.constant 2 : index
    %c0_52 = arith.constant 0 : index
    %79 = vector.load %arg8[%c2_51, %c0_52] : memref<10x8xf32, #tpu.memory_space<vmem>>, vector<1x8xf32>
    tpu.vector_store %arg8[%c2_51, %c0_52], %78 {strides = array<i32>} : memref<10x8xf32, #tpu.memory_space<vmem>>, vector<1x8xf32>,
    %c2_53 = arith.constant 2 : index
    %c0_54 = arith.constant 0 : index
    %80 = vector.load %arg9[%c2_53, %c0_54] : memref<10x8xf32, #tpu.memory_space<vmem>>, vector<1x8xf32>
    %cst_55 = arith.constant dense<0.000000e+00> : vector<8xf32>
    %81 = vector.multi_reduction <add>, %72, %cst_55 [0] : vector<8x8xf32> to vector<8xf32>
    %82 = vector.shape_cast %81 : vector<8xf32> to vector<1x8xf32>
    %83 = arith.addf %80, %82 : vector<1x8xf32>
    %c2_56 = arith.constant 2 : index
    %c0_57 = arith.constant 0 : index
    %84 = vector.load %arg9[%c2_56, %c0_57] : memref<10x8xf32, #tpu.memory_space<vmem>>, vector<1x8xf32>
    tpu.vector_store %arg9[%c2_56, %c0_57], %83 {strides = array<i32>} : memref<10x8xf32, #tpu.memory_space<vmem>>, vector<1x8xf32>,
    %cst_58 = arith.constant 3.000000e+00 : f32
    %85 = vector.broadcast %cst_58 : f32 to vector<8x8xf32>
    %86 = arith.subf %15, %85 : vector<8x8xf32>
    %87 = math.absf %86 : vector<8x8xf32>
    %cst_59 = arith.constant 1.000000e+00 : f32
    %88 = vector.broadcast %cst_59 : f32 to vector<8x8xf32>
    %89 = arith.subf %88, %87 : vector<8x8xf32>
    %cst_60 = arith.constant 0.000000e+00 : f32
    %90 = vector.broadcast %cst_60 : f32 to vector<8x8xf32>
    %91 = arith.maximumf %89, %90 : vector<8x8xf32>
    %c3 = arith.constant 3 : index
    %c0_61 = arith.constant 0 : index
    %92 = vector.load %arg8[%c3, %c0_61] : memref<10x8xf32, #tpu.memory_space<vmem>>, vector<1x8xf32>
    %cst_62 = arith.constant 0.000000e+00 : f32
    %93 = vector.broadcast %cst_62 : f32 to vector<8x8xf32>
    %94 = arith.select %20, %91, %93 : vector<8x8xi1>, vector<8x8xf32>
    %cst_63 = arith.constant dense<0.000000e+00> : vector<8xf32>
    %95 = vector.multi_reduction <add>, %94, %cst_63 [0] : vector<8x8xf32> to vector<8xf32>
    %96 = vector.shape_cast %95 : vector<8xf32> to vector<1x8xf32>
    %97 = arith.addf %92, %96 : vector<1x8xf32>
    %c3_64 = arith.constant 3 : index
    %c0_65 = arith.constant 0 : index
    %98 = vector.load %arg8[%c3_64, %c0_65] : memref<10x8xf32, #tpu.memory_space<vmem>>, vector<1x8xf32>
    tpu.vector_store %arg8[%c3_64, %c0_65], %97 {strides = array<i32>} : memref<10x8xf32, #tpu.memory_space<vmem>>, vector<1x8xf32>,
    %c3_66 = arith.constant 3 : index
    %c0_67 = arith.constant 0 : index
    %99 = vector.load %arg9[%c3_66, %c0_67] : memref<10x8xf32, #tpu.memory_space<vmem>>, vector<1x8xf32>
    %cst_68 = arith.constant dense<0.000000e+00> : vector<8xf32>
    %100 = vector.multi_reduction <add>, %91, %cst_68 [0] : vector<8x8xf32> to vector<8xf32>
    %101 = vector.shape_cast %100 : vector<8xf32> to vector<1x8xf32>
    %102 = arith.addf %99, %101 : vector<1x8xf32>
    %c3_69 = arith.constant 3 : index
    %c0_70 = arith.constant 0 : index
    %103 = vector.load %arg9[%c3_69, %c0_70] : memref<10x8xf32, #tpu.memory_space<vmem>>, vector<1x8xf32>
    tpu.vector_store %arg9[%c3_69, %c0_70], %102 {strides = array<i32>} : memref<10x8xf32, #tpu.memory_space<vmem>>, vector<1x8xf32>,
    %cst_71 = arith.constant 4.000000e+00 : f32
    %104 = vector.broadcast %cst_71 : f32 to vector<8x8xf32>
    %105 = arith.subf %15, %104 : vector<8x8xf32>
    %106 = math.absf %105 : vector<8x8xf32>
    %cst_72 = arith.constant 1.000000e+00 : f32
    %107 = vector.broadcast %cst_72 : f32 to vector<8x8xf32>
    %108 = arith.subf %107, %106 : vector<8x8xf32>
    %cst_73 = arith.constant 0.000000e+00 : f32
    %109 = vector.broadcast %cst_73 : f32 to vector<8x8xf32>
    %110 = arith.maximumf %108, %109 : vector<8x8xf32>
    %c4 = arith.constant 4 : index
    %c0_74 = arith.constant 0 : index
    %111 = vector.load %arg8[%c4, %c0_74] : memref<10x8xf32, #tpu.memory_space<vmem>>, vector<1x8xf32>
    %cst_75 = arith.constant 0.000000e+00 : f32
    %112 = vector.broadcast %cst_75 : f32 to vector<8x8xf32>
    %113 = arith.select %20, %110, %112 : vector<8x8xi1>, vector<8x8xf32>
    %cst_76 = arith.constant dense<0.000000e+00> : vector<8xf32>
    %114 = vector.multi_reduction <add>, %113, %cst_76 [0] : vector<8x8xf32> to vector<8xf32>
    %115 = vector.shape_cast %114 : vector<8xf32> to vector<1x8xf32>
    %116 = arith.addf %111, %115 : vector<1x8xf32>
    %c4_77 = arith.constant 4 : index
    %c0_78 = arith.constant 0 : index
    %117 = vector.load %arg8[%c4_77, %c0_78] : memref<10x8xf32, #tpu.memory_space<vmem>>, vector<1x8xf32>
    tpu.vector_store %arg8[%c4_77, %c0_78], %116 {strides = array<i32>} : memref<10x8xf32, #tpu.memory_space<vmem>>, vector<1x8xf32>,
    %c4_79 = arith.constant 4 : index
    %c0_80 = arith.constant 0 : index
    %118 = vector.load %arg9[%c4_79, %c0_80] : memref<10x8xf32, #tpu.memory_space<vmem>>, vector<1x8xf32>
    %cst_81 = arith.constant dense<0.000000e+00> : vector<8xf32>
    %119 = vector.multi_reduction <add>, %110, %cst_81 [0] : vector<8x8xf32> to vector<8xf32>
    %120 = vector.shape_cast %119 : vector<8xf32> to vector<1x8xf32>
    %121 = arith.addf %118, %120 : vector<1x8xf32>
    %c4_82 = arith.constant 4 : index
    %c0_83 = arith.constant 0 : index
    %122 = vector.load %arg9[%c4_82, %c0_83] : memref<10x8xf32, #tpu.memory_space<vmem>>, vector<1x8xf32>
    tpu.vector_store %arg9[%c4_82, %c0_83], %121 {strides = array<i32>} : memref<10x8xf32, #tpu.memory_space<vmem>>, vector<1x8xf32>,
    %cst_84 = arith.constant 5.000000e+00 : f32
    %123 = vector.broadcast %cst_84 : f32 to vector<8x8xf32>
    %124 = arith.subf %15, %123 : vector<8x8xf32>
    %125 = math.absf %124 : vector<8x8xf32>
    %cst_85 = arith.constant 1.000000e+00 : f32
    %126 = vector.broadcast %cst_85 : f32 to vector<8x8xf32>
    %127 = arith.subf %126, %125 : vector<8x8xf32>
    %cst_86 = arith.constant 0.000000e+00 : f32
    %128 = vector.broadcast %cst_86 : f32 to vector<8x8xf32>
    %129 = arith.maximumf %127, %128 : vector<8x8xf32>
    %c5 = arith.constant 5 : index
    %c0_87 = arith.constant 0 : index
    %130 = vector.load %arg8[%c5, %c0_87] : memref<10x8xf32, #tpu.memory_space<vmem>>, vector<1x8xf32>
    %cst_88 = arith.constant 0.000000e+00 : f32
    %131 = vector.broadcast %cst_88 : f32 to vector<8x8xf32>
    %132 = arith.select %20, %129, %131 : vector<8x8xi1>, vector<8x8xf32>
    %cst_89 = arith.constant dense<0.000000e+00> : vector<8xf32>
    %133 = vector.multi_reduction <add>, %132, %cst_89 [0] : vector<8x8xf32> to vector<8xf32>
    %134 = vector.shape_cast %133 : vector<8xf32> to vector<1x8xf32>
    %135 = arith.addf %130, %134 : vector<1x8xf32>
    %c5_90 = arith.constant 5 : index
    %c0_91 = arith.constant 0 : index
    %136 = vector.load %arg8[%c5_90, %c0_91] : memref<10x8xf32, #tpu.memory_space<vmem>>, vector<1x8xf32>
    tpu.vector_store %arg8[%c5_90, %c0_91], %135 {strides = array<i32>} : memref<10x8xf32, #tpu.memory_space<vmem>>, vector<1x8xf32>,
    %c5_92 = arith.constant 5 : index
    %c0_93 = arith.constant 0 : index
    %137 = vector.load %arg9[%c5_92, %c0_93] : memref<10x8xf32, #tpu.memory_space<vmem>>, vector<1x8xf32>
    %cst_94 = arith.constant dense<0.000000e+00> : vector<8xf32>
    %138 = vector.multi_reduction <add>, %129, %cst_94 [0] : vector<8x8xf32> to vector<8xf32>
    %139 = vector.shape_cast %138 : vector<8xf32> to vector<1x8xf32>
    %140 = arith.addf %137, %139 : vector<1x8xf32>
    %c5_95 = arith.constant 5 : index
    %c0_96 = arith.constant 0 : index
    %141 = vector.load %arg9[%c5_95, %c0_96] : memref<10x8xf32, #tpu.memory_space<vmem>>, vector<1x8xf32>
    tpu.vector_store %arg9[%c5_95, %c0_96], %140 {strides = array<i32>} : memref<10x8xf32, #tpu.memory_space<vmem>>, vector<1x8xf32>,
    %cst_97 = arith.constant 6.000000e+00 : f32
    %142 = vector.broadcast %cst_97 : f32 to vector<8x8xf32>
    %143 = arith.subf %15, %142 : vector<8x8xf32>
    %144 = math.absf %143 : vector<8x8xf32>
    %cst_98 = arith.constant 1.000000e+00 : f32
    %145 = vector.broadcast %cst_98 : f32 to vector<8x8xf32>
    %146 = arith.subf %145, %144 : vector<8x8xf32>
    %cst_99 = arith.constant 0.000000e+00 : f32
    %147 = vector.broadcast %cst_99 : f32 to vector<8x8xf32>
    %148 = arith.maximumf %146, %147 : vector<8x8xf32>
    %c6 = arith.constant 6 : index
    %c0_100 = arith.constant 0 : index
    %149 = vector.load %arg8[%c6, %c0_100] : memref<10x8xf32, #tpu.memory_space<vmem>>, vector<1x8xf32>
    %cst_101 = arith.constant 0.000000e+00 : f32
    %150 = vector.broadcast %cst_101 : f32 to vector<8x8xf32>
    %151 = arith.select %20, %148, %150 : vector<8x8xi1>, vector<8x8xf32>
    %cst_102 = arith.constant dense<0.000000e+00> : vector<8xf32>
    %152 = vector.multi_reduction <add>, %151, %cst_102 [0] : vector<8x8xf32> to vector<8xf32>
    %153 = vector.shape_cast %152 : vector<8xf32> to vector<1x8xf32>
    %154 = arith.addf %149, %153 : vector<1x8xf32>
    %c6_103 = arith.constant 6 : index
    %c0_104 = arith.constant 0 : index
    %155 = vector.load %arg8[%c6_103, %c0_104] : memref<10x8xf32, #tpu.memory_space<vmem>>, vector<1x8xf32>
    tpu.vector_store %arg8[%c6_103, %c0_104], %154 {strides = array<i32>} : memref<10x8xf32, #tpu.memory_space<vmem>>, vector<1x8xf32>,
    %c6_105 = arith.constant 6 : index
    %c0_106 = arith.constant 0 : index
    %156 = vector.load %arg9[%c6_105, %c0_106] : memref<10x8xf32, #tpu.memory_space<vmem>>, vector<1x8xf32>
    %cst_107 = arith.constant dense<0.000000e+00> : vector<8xf32>
    %157 = vector.multi_reduction <add>, %148, %cst_107 [0] : vector<8x8xf32> to vector<8xf32>
    %158 = vector.shape_cast %157 : vector<8xf32> to vector<1x8xf32>
    %159 = arith.addf %156, %158 : vector<1x8xf32>
    %c6_108 = arith.constant 6 : index
    %c0_109 = arith.constant 0 : index
    %160 = vector.load %arg9[%c6_108, %c0_109] : memref<10x8xf32, #tpu.memory_space<vmem>>, vector<1x8xf32>
    tpu.vector_store %arg9[%c6_108, %c0_109], %159 {strides = array<i32>} : memref<10x8xf32, #tpu.memory_space<vmem>>, vector<1x8xf32>,
    %cst_110 = arith.constant 7.000000e+00 : f32
    %161 = vector.broadcast %cst_110 : f32 to vector<8x8xf32>
    %162 = arith.subf %15, %161 : vector<8x8xf32>
    %163 = math.absf %162 : vector<8x8xf32>
    %cst_111 = arith.constant 1.000000e+00 : f32
    %164 = vector.broadcast %cst_111 : f32 to vector<8x8xf32>
    %165 = arith.subf %164, %163 : vector<8x8xf32>
    %cst_112 = arith.constant 0.000000e+00 : f32
    %166 = vector.broadcast %cst_112 : f32 to vector<8x8xf32>
    %167 = arith.maximumf %165, %166 : vector<8x8xf32>
    %c7 = arith.constant 7 : index
    %c0_113 = arith.constant 0 : index
    %168 = vector.load %arg8[%c7, %c0_113] : memref<10x8xf32, #tpu.memory_space<vmem>>, vector<1x8xf32>
    %cst_114 = arith.constant 0.000000e+00 : f32
    %169 = vector.broadcast %cst_114 : f32 to vector<8x8xf32>
    %170 = arith.select %20, %167, %169 : vector<8x8xi1>, vector<8x8xf32>
    %cst_115 = arith.constant dense<0.000000e+00> : vector<8xf32>
    %171 = vector.multi_reduction <add>, %170, %cst_115 [0] : vector<8x8xf32> to vector<8xf32>
    %172 = vector.shape_cast %171 : vector<8xf32> to vector<1x8xf32>
    %173 = arith.addf %168, %172 : vector<1x8xf32>
    %c7_116 = arith.constant 7 : index
    %c0_117 = arith.constant 0 : index
    %174 = vector.load %arg8[%c7_116, %c0_117] : memref<10x8xf32, #tpu.memory_space<vmem>>, vector<1x8xf32>
    tpu.vector_store %arg8[%c7_116, %c0_117], %173 {strides = array<i32>} : memref<10x8xf32, #tpu.memory_space<vmem>>, vector<1x8xf32>,
    %c7_118 = arith.constant 7 : index
    %c0_119 = arith.constant 0 : index
    %175 = vector.load %arg9[%c7_118, %c0_119] : memref<10x8xf32, #tpu.memory_space<vmem>>, vector<1x8xf32>
    %cst_120 = arith.constant dense<0.000000e+00> : vector<8xf32>
    %176 = vector.multi_reduction <add>, %167, %cst_120 [0] : vector<8x8xf32> to vector<8xf32>
    %177 = vector.shape_cast %176 : vector<8xf32> to vector<1x8xf32>
    %178 = arith.addf %175, %177 : vector<1x8xf32>
    %c7_121 = arith.constant 7 : index
    %c0_122 = arith.constant 0 : index
    %179 = vector.load %arg9[%c7_121, %c0_122] : memref<10x8xf32, #tpu.memory_space<vmem>>, vector<1x8xf32>
    tpu.vector_store %arg9[%c7_121, %c0_122], %178 {strides = array<i32>} : memref<10x8xf32, #tpu.memory_space<vmem>>, vector<1x8xf32>,
    %cst_123 = arith.constant 8.000000e+00 : f32
    %180 = vector.broadcast %cst_123 : f32 to vector<8x8xf32>
    %181 = arith.subf %15, %180 : vector<8x8xf32>
    %182 = math.absf %181 : vector<8x8xf32>
    %cst_124 = arith.constant 1.000000e+00 : f32
    %183 = vector.broadcast %cst_124 : f32 to vector<8x8xf32>
    %184 = arith.subf %183, %182 : vector<8x8xf32>
    %cst_125 = arith.constant 0.000000e+00 : f32
    %185 = vector.broadcast %cst_125 : f32 to vector<8x8xf32>
    %186 = arith.maximumf %184, %185 : vector<8x8xf32>
    %c8 = arith.constant 8 : index
    %c0_126 = arith.constant 0 : index
    %187 = vector.load %arg8[%c8, %c0_126] : memref<10x8xf32, #tpu.memory_space<vmem>>, vector<1x8xf32>
    %cst_127 = arith.constant 0.000000e+00 : f32
    %188 = vector.broadcast %cst_127 : f32 to vector<8x8xf32>
    %189 = arith.select %20, %186, %188 : vector<8x8xi1>, vector<8x8xf32>
    %cst_128 = arith.constant dense<0.000000e+00> : vector<8xf32>
    %190 = vector.multi_reduction <add>, %189, %cst_128 [0] : vector<8x8xf32> to vector<8xf32>
    %191 = vector.shape_cast %190 : vector<8xf32> to vector<1x8xf32>
    %192 = arith.addf %187, %191 : vector<1x8xf32>
    %c8_129 = arith.constant 8 : index
    %c0_130 = arith.constant 0 : index
    %193 = vector.load %arg8[%c8_129, %c0_130] : memref<10x8xf32, #tpu.memory_space<vmem>>, vector<1x8xf32>
    tpu.vector_store %arg8[%c8_129, %c0_130], %192 {strides = array<i32>} : memref<10x8xf32, #tpu.memory_space<vmem>>, vector<1x8xf32>,
    %c8_131 = arith.constant 8 : index
    %c0_132 = arith.constant 0 : index
    %194 = vector.load %arg9[%c8_131, %c0_132] : memref<10x8xf32, #tpu.memory_space<vmem>>, vector<1x8xf32>
    %cst_133 = arith.constant dense<0.000000e+00> : vector<8xf32>
    %195 = vector.multi_reduction <add>, %186, %cst_133 [0] : vector<8x8xf32> to vector<8xf32>
    %196 = vector.shape_cast %195 : vector<8xf32> to vector<1x8xf32>
    %197 = arith.addf %194, %196 : vector<1x8xf32>
    %c8_134 = arith.constant 8 : index
    %c0_135 = arith.constant 0 : index
    %198 = vector.load %arg9[%c8_134, %c0_135] : memref<10x8xf32, #tpu.memory_space<vmem>>, vector<1x8xf32>
    tpu.vector_store %arg9[%c8_134, %c0_135], %197 {strides = array<i32>} : memref<10x8xf32, #tpu.memory_space<vmem>>, vector<1x8xf32>,
    %cst_136 = arith.constant 9.000000e+00 : f32
    %199 = vector.broadcast %cst_136 : f32 to vector<8x8xf32>
    %200 = arith.subf %15, %199 : vector<8x8xf32>
    %201 = math.absf %200 : vector<8x8xf32>
    %cst_137 = arith.constant 1.000000e+00 : f32
    %202 = vector.broadcast %cst_137 : f32 to vector<8x8xf32>
    %203 = arith.subf %202, %201 : vector<8x8xf32>
    %cst_138 = arith.constant 0.000000e+00 : f32
    %204 = vector.broadcast %cst_138 : f32 to vector<8x8xf32>
    %205 = arith.maximumf %203, %204 : vector<8x8xf32>
    %c9 = arith.constant 9 : index
    %c0_139 = arith.constant 0 : index
    %206 = vector.load %arg8[%c9, %c0_139] : memref<10x8xf32, #tpu.memory_space<vmem>>, vector<1x8xf32>
    %cst_140 = arith.constant 0.000000e+00 : f32
    %207 = vector.broadcast %cst_140 : f32 to vector<8x8xf32>
    %208 = arith.select %20, %205, %207 : vector<8x8xi1>, vector<8x8xf32>
    %cst_141 = arith.constant dense<0.000000e+00> : vector<8xf32>
    %209 = vector.multi_reduction <add>, %208, %cst_141 [0] : vector<8x8xf32> to vector<8xf32>
    %210 = vector.shape_cast %209 : vector<8xf32> to vector<1x8xf32>
    %211 = arith.addf %206, %210 : vector<1x8xf32>
    %c9_142 = arith.constant 9 : index
    %c0_143 = arith.constant 0 : index
    %212 = vector.load %arg8[%c9_142, %c0_143] : memref<10x8xf32, #tpu.memory_space<vmem>>, vector<1x8xf32>
    tpu.vector_store %arg8[%c9_142, %c0_143], %211 {strides = array<i32>} : memref<10x8xf32, #tpu.memory_space<vmem>>, vector<1x8xf32>,
    %c9_144 = arith.constant 9 : index
    %c0_145 = arith.constant 0 : index
    %213 = vector.load %arg9[%c9_144, %c0_145] : memref<10x8xf32, #tpu.memory_space<vmem>>, vector<1x8xf32>
    %cst_146 = arith.constant dense<0.000000e+00> : vector<8xf32>
    %214 = vector.multi_reduction <add>, %205, %cst_146 [0] : vector<8x8xf32> to vector<8xf32>
    %215 = vector.shape_cast %214 : vector<8xf32> to vector<1x8xf32>
    %216 = arith.addf %213, %215 : vector<1x8xf32>
    %c9_147 = arith.constant 9 : index
    %c0_148 = arith.constant 0 : index
    %217 = vector.load %arg9[%c9_147, %c0_148] : memref<10x8xf32, #tpu.memory_space<vmem>>, vector<1x8xf32>
    tpu.vector_store %arg9[%c9_147, %c0_148], %216 {strides = array<i32>} : memref<10x8xf32, #tpu.memory_space<vmem>>, vector<1x8xf32>,
    %c0_i32_149 = arith.constant 0 : i32
    %218 = arith.cmpi eq, %arg1, %c0_i32_149 : i32
    %219 = arith.extui %218 : i1 to i32
    %c0_i32_150 = arith.constant 0 : i32
    %220 = arith.cmpi ne, %219, %c0_i32_150 : i32
    scf.if %220 {
      %c0_151 = arith.constant 0 : index
      %c0_152 = arith.constant 0 : index
      %221 = vector.load %arg8[%c0_151, %c0_152] : memref<10x8xf32, #tpu.memory_space<vmem>>, vector<10x8xf32>
      %c0_153 = arith.constant 0 : index
      %c0_154 = arith.constant 0 : index
      %222 = vector.load %arg9[%c0_153, %c0_154] : memref<10x8xf32, #tpu.memory_space<vmem>>, vector<10x8xf32>
      %cst_155 = arith.constant 9.99999996E-13 : f32
      %223 = vector.broadcast %cst_155 : f32 to vector<10x8xf32>
      %224 = arith.maximumf %222, %223 : vector<10x8xf32>
      %225 = arith.divf %221, %224 : vector<10x8xf32>
      %c0_156 = arith.constant 0 : index
      %c0_157 = arith.constant 0 : index
      %226 = vector.load %arg10[%c0_156, %c0_157] : memref<1x8xf32, #tpu.memory_space<vmem>>, vector<1x8xf32>
      %227 = vector.broadcast %226 : vector<1x8xf32> to vector<10x8xf32>
      %228 = arith.divf %221, %227 : vector<10x8xf32>
      %229 = arith.mulf %225, %228 : vector<10x8xf32>
      %cst_158 = arith.constant dense<0.000000e+00> : vector<8xf32>
      %230 = vector.multi_reduction <add>, %229, %cst_158 [0] : vector<10x8xf32> to vector<8xf32>
      %231 = vector.shape_cast %230 : vector<8xf32> to vector<1x8xf32>
      %c0_159 = arith.constant 0 : index
      %c0_160 = arith.constant 0 : index
      %232 = vector.load %arg7[%c0_159, %c0_160] : memref<1x8xf32, #tpu.memory_space<vmem>>, vector<1x8xf32>
      tpu.vector_store %arg7[%c0_159, %c0_160], %231 {strides = array<i32>} : memref<1x8xf32, #tpu.memory_space<vmem>>, vector<1x8xf32>,
    } else {
    }
    return
  }
  func.func @transform_0(%arg0: i32, %arg1: i32) -> (i32, i32) {
    %c0_i32 = arith.constant 0 : i32
    %c0_i32_0 = arith.constant 0 : i32
    %c0_i32_1 = arith.constant 0 : i32
    return %c0_i32, %c0_i32_0 : i32, i32
  }
  func.func @transform_1(%arg0: i32, %arg1: i32) -> (i32, i32) {
    %c0_i32 = arith.constant 0 : i32
    %c0_i32_0 = arith.constant 0 : i32
    return %arg1, %c0_i32 : i32, i32
  }
  func.func @transform_2(%arg0: i32, %arg1: i32) -> (i32, i32) {
    %c0_i32 = arith.constant 0 : i32
    %c0_i32_0 = arith.constant 0 : i32
    return %arg0, %c0_i32 : i32, i32
  }
  func.func @transform_3(%arg0: i32, %arg1: i32) -> (i32, i32) {
    %c0_i32 = arith.constant 0 : i32
    %c0_i32_0 = arith.constant 0 : i32
    return %arg1, %c0_i32 : i32, i32
  }
  func.func @transform_4(%arg0: i32, %arg1: i32) -> (i32, i32) {
    %c0_i32 = arith.constant 0 : i32
    %c0_i32_0 = arith.constant 0 : i32
    return %c0_i32, %arg0 : i32, i32
  }
  func.func @transform_5(%arg0: i32, %arg1: i32) -> (i32, i32) {
    %c0_i32 = arith.constant 0 : i32
    %c0_i32_0 = arith.constant 0 : i32
    return %c0_i32, %arg0 : i32, i32
  }
}

module attributes {stable_mosaic.version = 11 : i64} {
  func.func @_min_prod_kernel(%arg0: i32, %arg1: i32, %arg2: memref<8x128xf32, #tpu.memory_space<vmem>>, %arg3: memref<8x128xf32, #tpu.memory_space<vmem>>, %arg4: memref<1x8xf32, #tpu.memory_space<vmem>>) attributes {dimension_semantics = [#tpu.dimension_semantics<parallel>, #tpu.dimension_semantics<arbitrary>], iteration_bounds = array<i64: 1, 1>, scalar_prefetch = 0 : i64, scratch_operands = 0 : i64, tpu.core_type = #tpu.core_type<tc>, window_params = [{transform_indices = @transform_0, window_bounds = array<i64: 8, 128>}, {transform_indices = @transform_1, window_bounds = array<i64: 8, 128>}, {transform_indices = @transform_2, window_bounds = array<i64: 1, 8>}]} {
    %c0_i32 = arith.constant 0 : i32
    %0 = arith.cmpi eq, %arg1, %c0_i32 : i32
    %1 = arith.extui %0 : i1 to i32
    %c0_i32_0 = arith.constant 0 : i32
    %2 = arith.cmpi ne, %1, %c0_i32_0 : i32
    scf.if %2 {
      %cst_9 = arith.constant 0x7F800000 : f32
      %11 = vector.broadcast %cst_9 : f32 to vector<1x8xf32>
      %c0_10 = arith.constant 0 : index
      %c0_11 = arith.constant 0 : index
      %12 = vector.load %arg4[%c0_10, %c0_11] : memref<1x8xf32, #tpu.memory_space<vmem>>, vector<1x8xf32>
      tpu.vector_store %arg4[%c0_10, %c0_11], %11 {strides = array<i32>} : memref<1x8xf32, #tpu.memory_space<vmem>>, vector<1x8xf32>,
    } else {
    }
    %c0 = arith.constant 0 : index
    %c0_1 = arith.constant 0 : index
    %3 = vector.load %arg2[%c0, %c0_1] : memref<8x128xf32, #tpu.memory_space<vmem>>, vector<8x128xf32>
    %c0_2 = arith.constant 0 : index
    %c0_3 = arith.constant 0 : index
    %4 = vector.load %arg3[%c0_2, %c0_3] : memref<8x128xf32, #tpu.memory_space<vmem>>, vector<8x128xf32>
    %cst = arith.constant dense<0.000000e+00> : vector<8x8xf32>
    %5 = tpu.matmul %3, %4, %cst {dimension_numbers = #tpu.dot_dimension_numbers<[1], [1], [0], [0], [0, 0, 1, 0], [], []>} : vector<8x128xf32>, vector<8x128xf32>, vector<8x8xf32> -> vector<8x8xf32>
    %c0_4 = arith.constant 0 : index
    %c0_5 = arith.constant 0 : index
    %6 = vector.load %arg4[%c0_4, %c0_5] : memref<1x8xf32, #tpu.memory_space<vmem>>, vector<1x8xf32>
    %cst_6 = arith.constant dense<0x7F800000> : vector<8xf32>
    %7 = vector.multi_reduction <minimumf>, %5, %cst_6 [0] : vector<8x8xf32> to vector<8xf32>
    %8 = vector.shape_cast %7 : vector<8xf32> to vector<1x8xf32>
    %9 = arith.minimumf %6, %8 : vector<1x8xf32>
    %c0_7 = arith.constant 0 : index
    %c0_8 = arith.constant 0 : index
    %10 = vector.load %arg4[%c0_7, %c0_8] : memref<1x8xf32, #tpu.memory_space<vmem>>, vector<1x8xf32>
    tpu.vector_store %arg4[%c0_7, %c0_8], %9 {strides = array<i32>} : memref<1x8xf32, #tpu.memory_space<vmem>>, vector<1x8xf32>,
    return
  }
  func.func @transform_0(%arg0: i32, %arg1: i32) -> (i32, i32) {
    %c0_i32 = arith.constant 0 : i32
    %c0_i32_0 = arith.constant 0 : i32
    return %arg1, %c0_i32 : i32, i32
  }
  func.func @transform_1(%arg0: i32, %arg1: i32) -> (i32, i32) {
    %c0_i32 = arith.constant 0 : i32
    %c0_i32_0 = arith.constant 0 : i32
    return %arg0, %c0_i32 : i32, i32
  }
  func.func @transform_2(%arg0: i32, %arg1: i32) -> (i32, i32) {
    %c0_i32 = arith.constant 0 : i32
    %c0_i32_0 = arith.constant 0 : i32
    return %c0_i32, %arg0 : i32, i32
  }
}

</mosaic_0001>

<bundles_post_ra>
// kernel: ap_loss.2
= control target key start
LH: loop header
LB: loop body
LE: loop exit
PB: predicated region body
PF: predicated region fallthrough
CT: control target
= control target key end

     0   :  { %vm15_vm0 = vcmask 57344   ;;  %v56_v1 = vmov inf   ;;  %vm40_vm1 = vcmask 64512   ;;  %s89_s1 = inlined_call_operand.vmem [shape: f32[8,128], index: 1, kind: input, shape index: {}]   ;;  %s90_s0 = inlined_call_operand.vmem [shape: f32[8,128], index: 0, kind: input, shape index: {}]   ;;  %s91_s2 = inlined_call_operand.vmem [shape: f32[1,8], index: 2, kind: output, shape index: {}]  }
   0x1   :  { %v18_v0 = vld [vmem:[%s89_s1] sm:$0xff]  ;;  %16 = vst.msk [vmem:[%s91_s2] sm:$0x1] %vm15_vm0, %v56_v1 }
   0x2   :  { %34 = vmatpush.xpose.msra.mxu0 %v18_v0  ;;  %v17_v2 = vld [vmem:[%s90_s0] sm:$0xff] }
   0x5   :  { %35 = vmatmul.f32.vlgmr.msra.gmra.mxu0 %v17_v2 }
   0x8   :  { %v39_v10 = vld [vmem:[%s91_s2] sm:$0x1] }
  0x82   :  { %v36_v3 = vpop.f32.mrf.mxu0 }
  0x83   :  { %v41_v4 = vsel %vm40_vm1, %v36_v3, inf }
  0x84   :  { %v42_v5 = vrot.slane %v41_v4, 4 }
  0x86   :  { %v43_v6 = vmin.f32 %v41_v4, %v42_v5 }
  0x88   :  { %v44_v7 = vrot.slane %v43_v6, 2 }
  0x8a   :  { %v45_v8 = vmin.f32 %v43_v6, %v44_v7 }
  0x8c   :  { %v46_v9 = vrot.slane %v45_v8, 1 }
  0x8e   :  { %v47_v11 = vmin.f32 %v45_v8, %v46_v9 }
  0x90   :  { %v48_v12 = vmin.f32 %v39_v10, %v47_v11 }
  0x92   :  { %50 = vst.msk [vmem:[%s91_s2] sm:$0x1] %vm15_vm0, %v48_v12 }

// kernel: ap_loss.3
= control target key start
LH: loop header
LB: loop body
LE: loop exit
PB: predicated region body
PF: predicated region fallthrough
CT: control target
= control target key end

     0   :  { %v442_v1 = vmov 0   ;;  %vm25_vm0 = vcmask 64512   ;;  %v443_v7 = vmov 0.0   ;;  %vm31_vm2 = vcmask 57344   ;;  %s609_s2 = inlined_call_operand.vmem [shape: f32[8,128], index: 2, kind: input, shape index: {}]   ;;  %s610_s1 = inlined_call_operand.vmem [shape: f32[8,128], index: 1, kind: input, shape index: {}]   ;;  %s611_s3 = inlined_call_operand.vmem [shape: s32[8,1], index: 3, kind: input, shape index: {}]   ;;  %s612_s4 = inlined_call_operand.vmem [shape: s32[1,8], index: 4, kind: input, shape index: {}]   ;;  %s613_s0 = inlined_call_operand.<no memory space> [shape: f32[1,1], index: 0, kind: input, shape index: {}]   ;;  %s614_s5 = inlined_call_operand.vmem [shape: f32[1,8], index: 5, kind: output, shape index: {}]  }
   0x1   :  { %v34_v0 = vld [vmem:[%s609_s2] sm:$0xff]  ;;  %431 = vset.pattern.permute.xlu0 %v442_v1  ;;  %26 = vst.msk [vmem:[#allocation2] sm:$0xff] %vm25_vm0, %v443_v7  ;;  %vm27_vm3 = vcmask 58368   ;;  %v71_v30 = vstv %s613_s0 }
   0x2   :  { %v73_v2 = vld [vmem:[%s611_s3] sm:$0xff]  ;;  %50 = vmatpush.xpose.msra.mxu0 %v34_v0  ;;  %29 = vst.msk [vmem:[#allocation3] sm:$0xff] %vm25_vm0, %v443_v7 }
   0x3   :  { %v33_v3 = vld [vmem:[%s610_s1] sm:$0xff]  ;;  %76 = vperm.xlu0 %431, %v73_v2   ;;  %32 = vst.msk [vmem:[#allocation4] sm:$0x1] %vm31_vm2, %v443_v7 }
   0x4   :  { %v432_v4 = vld [vmem:[%s612_s4] ss:$0 sm:$0xff]  ;;  %28 = vst.msk [vmem:[#allocation2 + $0x8] sm:$0x3] %vm27_vm3, %v443_v7 }
   0x5   :  { %51 = vmatmul.f32.vlgmr.msra.gmra.mxu0 %v33_v3  ;;  %30 = vst.msk [vmem:[#allocation3 + $0x8] sm:$0x3] %vm27_vm3, %v443_v7 }
   0xa   :  { %v80_v17 = vld [vmem:[#allocation4] sm:$0x1] }
  0x75   :  { %v77_v5 = vpop.permute.xlu0 %76 }
  0x76   :  { %vm486_vm1 = vcmp.eq.s32.totalorder %v77_v5, %v432_v4 }
  0x77   :  { %v419_v8 = vsel %vm486_vm1, 1.0, %v443_v7 }
  0x78   :  { %v84_v9 = vsel %vm25_vm0, %v419_v8, 0.0 }
  0x79   :  { %v85_v10 = vrot.slane %v84_v9, 4 }
  0x7b   :  { %v86_v11 = vadd.f32 %v85_v10, %v84_v9 }
  0x7d   :  { %v87_v12 = vrot.slane %v86_v11, 2 }
  0x7f   :  { %v88_v13 = vadd.f32 %v87_v12, %v86_v11 }
  0x81   :  { %v89_v16 = vrot.slane %v88_v13, 1 }
  0x82   :  { %v52_v14 = vpop.f32.mrf.mxu0 }
  0x83   :  { %v55_v15 = vmul.f32 2.0, %v52_v14  ;;  %v90_v19 = vadd.f32 %v89_v16, %v88_v13 }
  0x85   :  { %v56_v18 = vsub.f32 2.0, %v55_v15  ;;  %v91_v21 = vadd.f32 %v90_v19, %v80_v17 }
  0x87   :  { %v57_v20 = vmax.f32 %v56_v18, 1e-12  ;;  %93 = vst.msk [vmem:[#allocation4] sm:$0x1] %vm31_vm2, %v91_v21 }
  0x89   :  { %434 = vrsqrt.f32 %v57_v20  ;;  %vm65_vm4 = vcmp.eq.f32.partialorder %v57_v20, inf  ;;  %v68_v29 = vand.u32 2147483648, %v57_v20  ;;  %vm67_vm5 = vcmp.eq.f32.partialorder %v57_v20, 0.0 }
  0x8f   :  { %v435_v22 = vpop.eup %434 }
  0x90   :  { %v59_v23 = vmul.f32 %v435_v22, %v57_v20 }
  0x92   :  { %v60_v24 = vmul.f32 %v435_v22, %v59_v23 }
  0x94   :  { %v61_v25 = vmul.f32 0.5, %v60_v24 }
  0x96   :  { %v62_v26 = vsub.f32 1.5, %v61_v25 }
  0x98   :  { %v63_v27 = vmul.f32 %v435_v22, %v62_v26 }
  0x9a   :  { %v64_v28 = vmul.f32 %v63_v27, %v57_v20 }
  0x9c   :  { %v66_v31 = vsel %vm65_vm4, %v57_v20, %v64_v28 }
  0x9d   :  { %v69_v32 = vsel %vm67_vm5, %v68_v29, %v66_v31 }
  0x9e   :  { %v502_v33 = vmul.f32 %v71_v30, %v69_v32 }
  0xa0   :  { %v94_v34 = vand.u32 2147483647, %v502_v33  ;;  %v420_v35 = vadd.f32 -1.0, %v502_v33  ;;  %v421_v36 = vadd.f32 -2.0, %v502_v33  ;;  %v422_v37 = vadd.f32 -3.0, %v502_v33 }
  0xa1   :  { %v423_v38 = vadd.f32 -4.0, %v502_v33  ;;  %v424_v39 = vadd.f32 -5.0, %v502_v33  ;;  %v511_v40 = vadd.f32 -6.0, %v502_v33  ;;  %v514_v41 = vadd.f32 -7.0, %v502_v33 }
  0xa2   :  { %v95_v42 = vsub.f32 1.0, %v94_v34  ;;  %v119_v43 = vand.u32 2147483647, %v420_v35  ;;  %v144_v44 = vand.u32 2147483647, %v421_v36  ;;  %v517_v45 = vadd.f32 -8.0, %v502_v33 }
  0xa3   :  { %v169_v46 = vand.u32 2147483647, %v422_v37  ;;  %v194_v47 = vand.u32 2147483647, %v423_v38  ;;  %v219_v48 = vand.u32 2147483647, %v424_v39 }
  0xa4   :  { %v96_v49 = vmax.f32 %v95_v42, 0.0  ;;  %v120_v50 = vsub.f32 1.0, %v119_v43  ;;  %v145_v51 = vsub.f32 1.0, %v144_v44  ;;  %v244_v52 = vand.u32 2147483647, %v511_v40 }
  0xa5   :  { %v170_v53 = vsub.f32 1.0, %v169_v46  ;;  %v520_v54 = vsub.f32 1.0, %v194_v47  ;;  %v522_v55 = vsub.f32 1.0, %v219_v48  ;;  %v269_v56 = vand.u32 2147483647, %v514_v41 }
  0xa6   :  { %v98_v57 = vsel %vm486_vm1, %v96_v49, 0.0  ;;  %v109_v58 = vsel %vm25_vm0, %v96_v49, 0.0  ;;  %v121_v59 = vmax.f32 %v120_v50, 0.0  ;;  %v146_v60 = vmax.f32 %v145_v51, 0.0  ;;  %v108_v35 = vld [vmem:[#allocation3] sm:$0x1] }
  0xa7   :  { %v99_v61 = vsel %vm25_vm0, %v98_v57, 0.0  ;;  %v110_v62 = vrot.slane %v109_v58, 4  ;;  %v171_v63 = vmax.f32 %v170_v53, 0.0  ;;  %v196_v0 = vmax.f32 %v520_v54, 0.0  ;;  %v97_v42 = vld [vmem:[#allocation2] sm:$0x1] }
  0xa8   :  { %v100_v1 = vrot.slane %v99_v61, 4  ;;  %v123_v2 = vsel %vm486_vm1, %v121_v59, 0.0  ;;  %v134_v3 = vsel %vm25_vm0, %v121_v59, 0.0  ;;  %v148_v4 = vsel %vm486_vm1, %v146_v60, 0.0  ;;  %v133_v48 = vld [vmem:[#allocation3 + $0x1] sm:$0x1] }
  0xa9   :  { %v111_v5 = vadd.f32 %v110_v62, %v109_v58  ;;  %v124_v7 = vsel %vm25_vm0, %v123_v2, 0.0  ;;  %v135_v8 = vrot.slane %v134_v3, 4  ;;  %v149_v9 = vsel %vm25_vm0, %v148_v4, 0.0  ;;  %v122_v57 = vld [vmem:[#allocation2 + $0x1] sm:$0x1] }
  0xaa   :  { %v101_v10 = vadd.f32 %v100_v1, %v99_v61  ;;  %v125_v11 = vrot.slane %v124_v7, 4  ;;  %v150_v12 = vrot.slane %v149_v9, 4  ;;  %v159_v13 = vsel %vm25_vm0, %v146_v60, 0.0  ;;  %v147_v58 = vld [vmem:[#allocation2 + $0x2] sm:$0x1] }
  0xab   :  { %v112_v14 = vrot.slane %v111_v5, 2  ;;  %v136_v15 = vadd.f32 %v135_v8, %v134_v3  ;;  %v160_v16 = vrot.slane %v159_v13, 4  ;;  %v173_v17 = vsel %vm486_vm1, %v171_v63, 0.0 }
  0xac   :  { %v102_v18 = vrot.slane %v101_v10, 2  ;;  %v126_v19 = vadd.f32 %v125_v11, %v124_v7  ;;  %v151_v20 = vadd.f32 %v150_v12, %v149_v9  ;;  %v174_v21 = vsel %vm25_vm0, %v173_v17, 0.0 }
  0xad   :  { %v113_v22 = vadd.f32 %v112_v14, %v111_v5  ;;  %v137_v23 = vrot.slane %v136_v15, 2  ;;  %v161_v24 = vadd.f32 %v160_v16, %v159_v13  ;;  %v175_v25 = vrot.slane %v174_v21, 4 }
  0xae   :  { %v103_v26 = vadd.f32 %v102_v18, %v101_v10  ;;  %v127_v27 = vrot.slane %v126_v19, 2  ;;  %v152_v28 = vrot.slane %v151_v20, 2  ;;  %v184_v29 = vsel %vm25_vm0, %v171_v63, 0.0  ;;  %v158_v63 = vld [vmem:[#allocation3 + $0x2] sm:$0x1] }
  0xaf   :  { %v114_v30 = vrot.slane %v113_v22, 1  ;;  %v138_v31 = vadd.f32 %v137_v23, %v136_v15  ;;  %v162_v32 = vrot.slane %v161_v24, 2  ;;  %v176_v34 = vadd.f32 %v175_v25, %v174_v21  ;;  %v172_v10 = vld [vmem:[#allocation2 + $0x3] sm:$0x1]  ;;  %v183_v15 = vld [vmem:[#allocation3 + $0x3] sm:$0x1] }
  0xb0   :  { %v104_v36 = vrot.slane %v103_v26, 1  ;;  %v128_v37 = vadd.f32 %v127_v27, %v126_v19  ;;  %v153_v38 = vadd.f32 %v152_v28, %v151_v20  ;;  %v185_v39 = vrot.slane %v184_v29, 4 }
  0xb1   :  { %v115_v43 = vadd.f32 %v114_v30, %v113_v22  ;;  %v139_v44 = vrot.slane %v138_v31, 1  ;;  %v163_v46 = vadd.f32 %v162_v32, %v161_v24  ;;  %v177_v47 = vrot.slane %v176_v34, 2 }
  0xb2   :  { %v105_v49 = vadd.f32 %v104_v36, %v103_v26  ;;  %v129_v50 = vrot.slane %v128_v37, 1  ;;  %v154_v51 = vrot.slane %v153_v38, 1  ;;  %v186_v53 = vadd.f32 %v185_v39, %v184_v29 }
  0xb3   :  { %v116_v59 = vadd.f32 %v115_v43, %v108_v35  ;;  %v140_v60 = vadd.f32 %v139_v44, %v138_v31  ;;  %v164_v61 = vrot.slane %v163_v46, 1  ;;  %v178_v62 = vadd.f32 %v177_v47, %v176_v34 }
  0xb4   :  { %v106_v1 = vadd.f32 %v105_v49, %v97_v42  ;;  %v130_v2 = vadd.f32 %v129_v50, %v128_v37  ;;  %v155_v3 = vadd.f32 %v154_v51, %v153_v38  ;;  %v187_v4 = vrot.slane %v186_v53, 2 }
  0xb5   :  { %117 = vst.msk [vmem:[#allocation3] sm:$0x1] %vm31_vm2, %v116_v59  ;;  %v141_v5 = vadd.f32 %v140_v60, %v133_v48  ;;  %v165_v7 = vadd.f32 %v164_v61, %v163_v46  ;;  %v179_v8 = vrot.slane %v178_v62, 1  ;;  %v198_v9 = vsel %vm486_vm1, %v196_v0, 0.0  ;;  %v197_v48 = vld [vmem:[#allocation2 + $0x4] sm:$0x1] }
  0xb6   :  { %107 = vst.msk [vmem:[#allocation2] sm:$0x1] %vm31_vm2, %v106_v1  ;;  %v131_v11 = vadd.f32 %v130_v2, %v122_v57  ;;  %v156_v12 = vadd.f32 %v155_v3, %v147_v58  ;;  %v188_v13 = vadd.f32 %v187_v4, %v186_v53  ;;  %v199_v14 = vsel %vm25_vm0, %v198_v9, 0.0  ;;  %v208_v57 = vld [vmem:[#allocation3 + $0x4] sm:$0x1] }
  0xb7   :  { %142 = vst.msk [vmem:[#allocation3 + $0x1] sm:$0x1] %vm31_vm2, %v141_v5  ;;  %v166_v16 = vadd.f32 %v165_v7, %v158_v63  ;;  %v180_v17 = vadd.f32 %v179_v8, %v178_v62  ;;  %v200_v18 = vrot.slane %v199_v14, 4  ;;  %v209_v19 = vsel %vm25_vm0, %v196_v0, 0.0  ;;  %v233_v8 = vld [vmem:[#allocation3 + $0x5] sm:$0x1] }
  0xb8   :  { %132 = vst.msk [vmem:[#allocation2 + $0x1] sm:$0x1] %vm31_vm2, %v131_v11  ;;  %v189_v20 = vrot.slane %v188_v13, 1  ;;  %v210_v21 = vrot.slane %v209_v19, 4  ;;  %v221_v22 = vmax.f32 %v522_v55, 0.0  ;;  %v245_v23 = vsub.f32 1.0, %v244_v52 }
  0xb9   :  { %157 = vst.msk [vmem:[#allocation2 + $0x2] sm:$0x1] %vm31_vm2, %v156_v12  ;;  %v181_v24 = vadd.f32 %v180_v17, %v172_v10  ;;  %v201_v25 = vadd.f32 %v200_v18, %v199_v14  ;;  %v270_v26 = vsub.f32 1.0, %v269_v56  ;;  %v294_v54 = vand.u32 2147483647, %v517_v45 }
  0xba   :  { %167 = vst.msk [vmem:[#allocation3 + $0x2] sm:$0x1] %vm31_vm2, %v166_v16  ;;  %v190_v0 = vadd.f32 %v189_v20, %v188_v13  ;;  %v211_v27 = vadd.f32 %v210_v21, %v209_v19  ;;  %v223_v28 = vsel %vm486_vm1, %v221_v22, 0.0  ;;  %v234_v55 = vsel %vm25_vm0, %v221_v22, 0.0  ;;  %v222_v13 = vld [vmem:[#allocation2 + $0x5] sm:$0x1] }
  0xbb   :  { %182 = vst.msk [vmem:[#allocation2 + $0x3] sm:$0x1] %vm31_vm2, %v181_v24  ;;  %v202_v40 = vrot.slane %v201_v25, 2  ;;  %v224_v52 = vsel %vm25_vm0, %v223_v28, 0.0  ;;  %v235_v29 = vrot.slane %v234_v55, 4  ;;  %v246_v30 = vmax.f32 %v245_v23, 0.0 }
  0xbc   :  { %v191_v41 = vadd.f32 %v190_v0, %v183_v15  ;;  %v212_v56 = vrot.slane %v211_v27, 2  ;;  %v225_v31 = vrot.slane %v224_v52, 4  ;;  %v271_v45 = vmax.f32 %v270_v26, 0.0  ;;  %v258_v22 = vld [vmem:[#allocation3 + $0x6] sm:$0x1] }
  0xbd   :  { %v203_v32 = vadd.f32 %v202_v40, %v201_v25  ;;  %v236_v34 = vadd.f32 %v235_v29, %v234_v55  ;;  %v248_v35 = vsel %vm486_vm1, %v246_v30, 0.0  ;;  %v259_v36 = vsel %vm25_vm0, %v246_v30, 0.0  ;;  %v247_v0 = vld [vmem:[#allocation2 + $0x6] sm:$0x1] }
  0xbe   :  { %192 = vst.msk [vmem:[#allocation3 + $0x3] sm:$0x1] %vm31_vm2, %v191_v41  ;;  %v213_v37 = vadd.f32 %v212_v56, %v211_v27  ;;  %v226_v38 = vadd.f32 %v225_v31, %v224_v52  ;;  %v249_v39 = vsel %vm25_vm0, %v248_v35, 0.0  ;;  %v260_v42 = vrot.slane %v259_v36, 4 }
  0xbf   :  { %v204_v43 = vrot.slane %v203_v32, 1  ;;  %v237_v44 = vrot.slane %v236_v34, 2  ;;  %v250_v46 = vrot.slane %v249_v39, 4  ;;  %v273_v47 = vsel %vm486_vm1, %v271_v45, 0.0 }
  0xc0   :  { %v214_v49 = vrot.slane %v213_v37, 1  ;;  %v227_v50 = vrot.slane %v226_v38, 2  ;;  %v261_v51 = vadd.f32 %v260_v42, %v259_v36  ;;  %v274_v53 = vsel %vm25_vm0, %v273_v47, 0.0 }
  0xc1   :  { %v205_v58 = vadd.f32 %v204_v43, %v203_v32  ;;  %v238_v59 = vadd.f32 %v237_v44, %v236_v34  ;;  %v251_v60 = vadd.f32 %v250_v46, %v249_v39  ;;  %v275_v61 = vrot.slane %v274_v53, 4  ;;  %v283_v39 = vld [vmem:[#allocation3 + $0x7] sm:$0x1] }
  0xc2   :  { %v215_v62 = vadd.f32 %v214_v49, %v213_v37  ;;  %v228_v63 = vadd.f32 %v227_v50, %v226_v38  ;;  %v262_v1 = vrot.slane %v261_v51, 2  ;;  %v284_v2 = vsel %vm25_vm0, %v271_v45, 0.0 }
  0xc3   :  { %v206_v3 = vadd.f32 %v205_v58, %v197_v48  ;;  %v239_v4 = vrot.slane %v238_v59, 1  ;;  %v252_v5 = vrot.slane %v251_v60, 2  ;;  %v276_v7 = vadd.f32 %v275_v61, %v274_v53 }
  0xc4   :  { %v216_v9 = vadd.f32 %v215_v62, %v208_v57  ;;  %v229_v10 = vrot.slane %v228_v63, 1  ;;  %v263_v11 = vadd.f32 %v262_v1, %v261_v51  ;;  %v285_v12 = vrot.slane %v284_v2, 4  ;;  %v308_v1 = vld [vmem:[#allocation3 + $0x8] sm:$0x1] }
  0xc5   :  { %207 = vst.msk [vmem:[#allocation2 + $0x4] sm:$0x1] %vm31_vm2, %v206_v3  ;;  %v240_v14 = vadd.f32 %v239_v4, %v238_v59  ;;  %v253_v15 = vadd.f32 %v252_v5, %v251_v60  ;;  %v277_v16 = vrot.slane %v276_v7, 2  ;;  %v295_v17 = vsub.f32 1.0, %v294_v54  ;;  %v297_v4 = vld [vmem:[#allocation2 + $0x8] sm:$0x1] }
  0xc6   :  { %217 = vst.msk [vmem:[#allocation3 + $0x4] sm:$0x1] %vm31_vm2, %v216_v9  ;;  %v230_v18 = vadd.f32 %v229_v10, %v228_v63  ;;  %v264_v19 = vrot.slane %v263_v11, 1  ;;  %v286_v20 = vadd.f32 %v285_v12, %v284_v2  ;;  %v428_v21 = vadd.f32 -9.0, %v502_v33  ;;  %v272_v33 = vld [vmem:[#allocation2 + $0x7] sm:$0x1] }
  0xc7   :  { %v241_v23 = vadd.f32 %v240_v14, %v233_v8  ;;  %v254_v24 = vrot.slane %v253_v15, 1  ;;  %v278_v25 = vadd.f32 %v277_v16, %v276_v7  ;;  %v296_v26 = vmax.f32 %v295_v17, 0.0  ;;  %v433_v63 = vld [vmem:[#allocation4] ss:$0 sm:$0xff]  ;;  %v333_v14 = vld [vmem:[#allocation3 + $0x9] sm:$0x1] }
  0xc8   :  { %v231_v27 = vadd.f32 %v230_v18, %v222_v13  ;;  %v265_v28 = vadd.f32 %v264_v19, %v263_v11  ;;  %v287_v55 = vrot.slane %v286_v20, 2  ;;  %v319_v40 = vand.u32 2147483647, %v428_v21  ;;  %v322_v17 = vld [vmem:[#allocation2 + $0x9] sm:$0x1] }
  0xc9   :  { %242 = vst.msk [vmem:[#allocation3 + $0x5] sm:$0x1] %vm31_vm2, %v241_v23  ;;  %v255_v54 = vadd.f32 %v254_v24, %v253_v15  ;;  %v279_v52 = vrot.slane %v278_v25, 1  ;;  %v298_v29 = vsel %vm486_vm1, %v296_v26, 0.0  ;;  %v309_v30 = vsel %vm25_vm0, %v296_v26, 0.0 }
  0xca   :  { %232 = vst.msk [vmem:[#allocation2 + $0x5] sm:$0x1] %vm31_vm2, %v231_v27  ;;  %v266_v41 = vadd.f32 %v265_v28, %v258_v22  ;;  %v288_v56 = vadd.f32 %v287_v55, %v286_v20  ;;  %v299_v31 = vsel %vm25_vm0, %v298_v29, 0.0  ;;  %v310_v45 = vrot.slane %v309_v30, 4 }
  0xcb   :  { %v256_v32 = vadd.f32 %v255_v54, %v247_v0  ;;  %v280_v34 = vadd.f32 %v279_v52, %v278_v25  ;;  %v300_v35 = vrot.slane %v299_v31, 4  ;;  %v320_v36 = vsub.f32 1.0, %v319_v40 }
  0xcc   :  { %267 = vst.msk [vmem:[#allocation3 + $0x6] sm:$0x1] %vm31_vm2, %v266_v41  ;;  %v289_v37 = vrot.slane %v288_v56, 1  ;;  %v311_v38 = vadd.f32 %v310_v45, %v309_v30  ;;  %436 = vrcp.f32 %v433_v63  ;;  %vm391_vm6 = vweird.f32 %v433_v63 }
  0xcd   :  { %257 = vst.msk [vmem:[#allocation2 + $0x6] sm:$0x1] %vm31_vm2, %v256_v32  ;;  %v281_v42 = vadd.f32 %v280_v34, %v272_v33  ;;  %v301_v43 = vadd.f32 %v300_v35, %v299_v31  ;;  %v321_v44 = vmax.f32 %v320_v36, 0.0  ;;  %v397_v30 = vand.u32 2147483648, %v433_v63 }
  0xce   :  { %v290_v46 = vadd.f32 %v289_v37, %v288_v56  ;;  %v312_v47 = vrot.slane %v311_v38, 2  ;;  %v395_v31 = vand.u32 2147483647, %v433_v63 }
  0xcf   :  { %282 = vst.msk [vmem:[#allocation2 + $0x7] sm:$0x1] %vm31_vm2, %v281_v42  ;;  %v302_v48 = vrot.slane %v301_v43, 2  ;;  %v323_v49 = vsel %vm486_vm1, %v321_v44, 0.0  ;;  %v334_v50 = vsel %vm25_vm0, %v321_v44, 0.0  ;;  %v398_v35 = vor.u32 1.1754944e-38, %v397_v30 }
  0xd0   :  { %v291_v51 = vadd.f32 %v290_v46, %v283_v39  ;;  %v313_v53 = vadd.f32 %v312_v47, %v311_v38  ;;  %v324_v57 = vsel %vm25_vm0, %v323_v49, 0.0  ;;  %v335_v58 = vrot.slane %v334_v50, 4 }
  0xd1   :  { %v303_v59 = vadd.f32 %v302_v48, %v301_v43  ;;  %v325_v60 = vrot.slane %v324_v57, 4  ;;  %vm396_vm13 = vcmp.eq.f32.partialorder %v395_v31, 8.507059e+37 }
  0xd2   :  { %292 = vst.msk [vmem:[#allocation3 + $0x7] sm:$0x1] %vm31_vm2, %v291_v51  ;;  %v314_v61 = vrot.slane %v313_v53, 1  ;;  %v336_v62 = vadd.f32 %v335_v58, %v334_v50  ;;  %v437_v21 = vpop.eup %436 }
  0xd3   :  { %v304_v2 = vrot.slane %v303_v59, 1  ;;  %v326_v3 = vadd.f32 %v325_v60, %v324_v57  ;;  %v387_v24 = vmul.f32 %v437_v21, %v433_v63  ;;  %vm392_vm7 = vweird.f32 %v437_v21 }
  0xd4   :  { %v315_v6 = vadd.f32 %v314_v61, %v313_v53  ;;  %v337_v5 = vrot.slane %v336_v62, 2  ;;  %vm597_vm10 = vmor %vm391_vm6, %vm392_vm7 }
  0xd5   :  { %v305_v7 = vadd.f32 %v304_v2, %v303_v59  ;;  %v327_v8 = vrot.slane %v326_v3, 2  ;;  %v388_v0 = vsub.f32 1.0, %v387_v24 }
  0xd6   :  { %v316_v9 = vadd.f32 %v315_v6, %v308_v1  ;;  %v338_v10 = vadd.f32 %v337_v5, %v336_v62  ;;  %v346_v42 = vld [vmem:[#allocation2] sm:$0xff] }
  0xd7   :  { %v306_v11 = vadd.f32 %v305_v7, %v297_v4  ;;  %v328_v12 = vadd.f32 %v327_v8, %v326_v3  ;;  %v389_v54 = vmul.f32 %v437_v21, %v388_v0 }
  0xd8   :  { %317 = vst.msk [vmem:[#allocation3 + $0x8] sm:$0x1] %vm31_vm2, %v316_v9  ;;  %v339_v13 = vrot.slane %v338_v10, 1 }
  0xd9   :  { %307 = vst.msk [vmem:[#allocation2 + $0x8] sm:$0x1] %vm31_vm2, %v306_v11  ;;  %v329_v15 = vrot.slane %v328_v12, 1  ;;  %v348_v16 = vld [vmem:[#allocation3] sm:$0xff]  ;;  %v390_v41 = vadd.f32 %v437_v21, %v389_v54 }
  0xda   :  { %v340_v18 = vadd.f32 %v339_v13, %v338_v10  ;;  %v350_v19 = vmax.f32 %v348_v16, 1e-12 }
  0xdb   :  { %v330_v20 = vadd.f32 %v329_v15, %v328_v12  ;;  %v394_v37 = vsel %vm597_vm10, %v437_v21, %v390_v41 }
  0xdc   :  { %v341_v22 = vadd.f32 %v340_v18, %v333_v14  ;;  %438 = vrcp.f32 %v350_v19  ;;  %v363_v29 = vand.u32 2147483648, %v350_v19  ;;  %vm357_vm9 = vweird.f32 %v350_v19 }
  0xdd   :  { %v331_v23 = vadd.f32 %v330_v20, %v322_v17  ;;  %v361_v33 = vand.u32 2147483647, %v350_v19  ;;  %v399_v44 = vsel %vm396_vm13, %v398_v35, %v394_v37 }
  0xde   :  { %342 = vst.msk [vmem:[#allocation3 + $0x9] sm:$0x1] %vm31_vm2, %v341_v22  ;;  %v364_v34 = vor.u32 1.1754944e-38, %v363_v29  ;;  %v400_v50 = vmul.f32 %v399_v44, %v346_v42 }
  0xdf   :  { %332 = vst.msk [vmem:[#allocation2 + $0x9] sm:$0x1] %vm31_vm2, %v331_v23  ;;  %vm362_vm12 = vcmp.eq.f32.partialorder %v361_v33, 8.507059e+37 }
  0xe2   :  { %v439_v25 = vpop.eup %438 }
  0xe3   :  { %v353_v26 = vmul.f32 %v439_v25, %v350_v19  ;;  %vm358_vm8 = vweird.f32 %v439_v25 }
  0xe4   :  { %vm359_vm11 = vmor %vm357_vm9, %vm358_vm8 }
  0xe5   :  { %v349_v27 = vld [vmem:[#allocation3 + $0x8] sm:$0x3]  ;;  %v354_v28 = vsub.f32 1.0, %v353_v26 }
  0xe6   :  { %v351_v55 = vmax.f32 %v349_v27, 1e-12  ;;  %v347_v51 = vld [vmem:[#allocation2 + $0x8] sm:$0x3] }
  0xe7   :  { %v355_v40 = vmul.f32 %v439_v25, %v354_v28  ;;  %v401_v61 = vmul.f32 %v399_v44, %v347_v51 }
  0xe8   :  { %440 = vrcp.f32 %v351_v55  ;;  %v378_v43 = vand.u32 2147483648, %v351_v55  ;;  %v376_v48 = vand.u32 2147483647, %v351_v55  ;;  %vm372_vm15 = vweird.f32 %v351_v55 }
  0xe9   :  { %v356_v52 = vadd.f32 %v439_v25, %v355_v40 }
  0xea   :  { %v379_v53 = vor.u32 1.1754944e-38, %v378_v43  ;;  %vm377_vm4 = vcmp.eq.f32.partialorder %v376_v48, 8.507059e+37 }
  0xeb   :  { %v360_v45 = vsel %vm359_vm11, %v439_v25, %v356_v52 }
  0xec   :  { %v365_v38 = vsel %vm362_vm12, %v364_v34, %v360_v45 }
  0xed   :  { %v366_v46 = vmul.f32 %v365_v38, %v346_v42 }
  0xee   :  { %v441_v32 = vpop.eup %440 }
  0xef   :  { %v368_v36 = vmul.f32 %v441_v32, %v351_v55  ;;  %vm373_vm14 = vweird.f32 %v441_v32  ;;  %v402_v58 = vmul.f32 %v400_v50, %v366_v46 }
  0xf0   :  { %vm374_vm1 = vmor %vm372_vm15, %vm373_vm14 }
  0xf1   :  { %v369_v39 = vsub.f32 1.0, %v368_v36  ;;  %v404_v63 = vsel %vm25_vm0, %v402_v58, 0.0 }
  0xf3   :  { %v370_v47 = vmul.f32 %v441_v32, %v369_v39 }
  0xf5   :  { %v371_v49 = vadd.f32 %v441_v32, %v370_v47 }
  0xf7   :  { %v375_v57 = vsel %vm374_vm1, %v441_v32, %v371_v49 }
  0xf8   :  { %v380_v59 = vsel %vm377_vm4, %v379_v53, %v375_v57 }
  0xf9   :  { %v381_v60 = vmul.f32 %v380_v59, %v347_v51 }
  0xfb   :  { %v403_v62 = vmul.f32 %v401_v61, %v381_v60 }
  0xfd   :  { %v406_v1 = vsel %vm27_vm3, %v403_v62, 0.0 }
  0xfe   :  { %v407_v2 = vadd.f32 %v406_v1, %v404_v63 }
 0x100   :  { %v408_v3 = vrot.slane %v407_v2, 4 }
 0x102   :  { %v409_v4 = vadd.f32 %v408_v3, %v407_v2 }
 0x104   :  { %v410_v6 = vrot.slane %v409_v4, 2 }
 0x106   :  { %v411_v5 = vadd.f32 %v410_v6, %v409_v4 }
 0x108   :  { %v412_v7 = vrot.slane %v411_v5, 1 }
 0x10a   :  { %v413_v8 = vadd.f32 %v412_v7, %v411_v5 }
 0x10c   :  { %414 = vst.msk [vmem:[%s614_s5] sm:$0x1] %vm31_vm2, %v413_v8 }

</bundles_post_ra>
